<compile_context>
chip_gen: v7x
topology: tpu7x:2x2x1
jax: 0.10.0
libtpu: 0.0.40
codegen_flags: <defaults>
</compile_context>

<pallas_src>
import math
import jax
import jax.numpy as jnp
from jax.experimental import pallas as pl
from jax.experimental.pallas import tpu as pltpu


class SequentialExPallas:
    """Minimal analog of fastai SequentialEx: applies layers in order."""
    # TODO(synk): PyTorch's `res.orig = x` attribute (module-input access for layers such
    # as MergeLayer) has no JAX tensor-attribute analog; layers that need the original
    # input must close over it explicitly.

    def __init__(self, *layers):
        self.layers = list(layers)

    def __call__(self, x):
        res = x
        for l in self.layers:
            res = l(res)
        return res


def self_attn_kernel(gamma_ref, nvalid_ref, xj_ref, xi_ref, wvq_ref, wk_ref, o_ref,
                     m_scr, l_scr, acc_scr, g_scr):
    # gamma_ref: (1,) f32 SMEM, nvalid_ref: (1,) i32 SMEM
    # xj_ref: (1, C, Nj)  block of x for the output columns j (kept across the i loop)
    # xi_ref: (1, C, Ni)  block of x for the softmax/reduction rows i
    # wvq_ref: (C + C8, C)  fused [wv; wq] (mxu dtype), wk_ref: (C8, C)
    # o_ref: (1, C, Nj)
    # scratch: m (1,Nj) f32, l (1,Nj) f32, acc (C,Nj) f32, g (C8,Nj) mxu dtype
    C = xj_ref.shape[1]
    ni_blk = xi_ref.shape[2]
    i = pl.program_id(2)
    mxu_dt = wvq_ref.dtype

    @pl.when(i == 0)
    def _init():
        m_scr[...] = jnp.full_like(m_scr, -1e30)
        l_scr[...] = jnp.zeros_like(l_scr)
        acc_scr[...] = jnp.zeros_like(acc_scr)
        # key projection g_j computed once per (b, j) tile and cached in VMEM scratch
        xj = xj_ref[0].astype(mxu_dt)                                   # (C, Nj)
        g_scr[...] = jnp.dot(wk_ref[...], xj,
                             preferred_element_type=jnp.float32).astype(g_scr.dtype)

    # fused value+query 1x1 conv on the i block: one MXU matmul instead of two
    xi = xi_ref[0].astype(mxu_dt)                                       # (C, Ni)
    vh = jnp.dot(wvq_ref[...], xi, preferred_element_type=jnp.float32)  # (C+C8, Ni) f32
    h_i = vh[:C, :].astype(mxu_dt)                                      # (C, Ni)  value
    f_i = vh[C:, :].astype(mxu_dt)                                      # (C8, Ni) query

    # scores s[i, j] = sum_c f[c, i] * g[c, j] — contract channel dim directly,
    # no explicit transpose (avoids an XLU transpose + VMEM copy).
    s = jax.lax.dot_general(f_i, g_scr[...],
                            dimension_numbers=(((0,), (0,)), ((), ())),
                            preferred_element_type=jnp.float32)         # (Ni, Nj)

    # mask rows that are spatial padding (global index >= true N)
    row = i * ni_blk + jax.lax.broadcasted_iota(jnp.int32, s.shape, 0)
    s = jnp.where(row < nvalid_ref[0], s, jnp.float32(-1e30))

    # online softmax over the i axis (== torch softmax dim=1); normalization deferred.
    # Running stats / accumulator stay in f32 even though MXU operands are bf16.
    m_prev = m_scr[...]
    m_new = jnp.maximum(m_prev, jnp.max(s, axis=0, keepdims=True))      # (1, Nj)
    alpha = jnp.exp(m_prev - m_new)
    p = jnp.exp(s - m_new)                                              # (Ni, Nj) f32
    l_scr[...] = alpha * l_scr[...] + jnp.sum(p, axis=0, keepdims=True)
    acc_scr[...] = alpha * acc_scr[...] + jnp.dot(h_i, p.astype(mxu_dt),
                                                  preferred_element_type=jnp.float32)
    m_scr[...] = m_new

    @pl.when(i == pl.num_programs(2) - 1)
    def _finalize():
        # deferred normalization: scale columns by 1/colsum on the EUP (approx recip)
        inv_l = pl.reciprocal(l_scr[...], approx=True)                  # (1, Nj)
        out = gamma_ref[0] * (acc_scr[...] * inv_l) + xj_ref[0].astype(jnp.float32)
        o_ref[0] = out.astype(o_ref.dtype)


def self_attention(x, wq, wk, wv, gamma, *, block_j=None, block_i=None,
                   mxu_dtype=jnp.bfloat16):
    B, C, H, W = x.shape
    N = H * W
    C8 = wq.shape[0]

    # pad N up to a multiple of 128 so all blocks / output stores are lane-dense
    N_pad = ((N + 127) // 128) * 128
    x_flat = x.reshape(B, C, N)
    if N_pad != N:
        x_flat = jnp.pad(x_flat, ((0, 0), (0, 0), (0, N_pad - N)))

    def _pick(blk):
        if blk is not None:
            if N_pad % blk != 0:
                raise ValueError(f"block size {blk} must divide padded N={N_pad}")
            return blk
        for cand in (512, 256, 128):  # sized for v7x's 64 MiB VMEM with room to spare
            if N_pad % cand == 0:
                return cand
        return N_pad

    nj = _pick(block_j)
    ni = _pick(block_i)

    # fuse value + query weights (both applied to the i block) into one matmul operand;
    # wv first so the slice point (row C) stays sublane-aligned.
    w_vq = jnp.concatenate([wv, wq], axis=0).astype(mxu_dtype)          # (C + C8, C)
    wk_m = wk.astype(mxu_dtype)                                         # (C8, C)
    gamma_s = jnp.asarray(gamma, jnp.float32).reshape(-1)[:1]           # (1,) scalar
    nvalid = jnp.array([N], dtype=jnp.int32)                            # (1,) scalar

    grid = (B, N_pad // nj, N_pad // ni)   # reduction axis (i) last / innermost

    flops = 2 * B * ((C + C8) * C * N_pad + C8 * C * N_pad
                     + C8 * N_pad * N_pad + C * N_pad * N_pad)
    cost = pl.CostEstimate(
        flops=int(flops),
        transcendentals=int(B * N_pad * N_pad),
        bytes_accessed=int(2 * B * C * N_pad * 4 + (C + 2 * C8) * C * 4))

    out = pl.pallas_call(
        self_attn_kernel,
        out_shape=jax.ShapeDtypeStruct((B, C, N_pad), x.dtype),
        grid=grid,
        in_specs=[
            pl.BlockSpec(memory_space=pltpu.MemorySpace.SMEM),           # gamma
            pl.BlockSpec(memory_space=pltpu.MemorySpace.SMEM),           # n_valid
            pl.BlockSpec((1, C, nj), lambda b, j, i: (b, 0, j)),         # x, output cols
            pl.BlockSpec((1, C, ni), lambda b, j, i: (b, 0, i)),         # x, softmax rows
            pl.BlockSpec((C + C8, C), lambda b, j, i: (0, 0)),           # fused wv|wq
            pl.BlockSpec((C8, C), lambda b, j, i: (0, 0)),               # wk
        ],
        out_specs=pl.BlockSpec((1, C, nj), lambda b, j, i: (b, 0, j)),
        scratch_shapes=[
            pltpu.VMEM((1, nj), jnp.float32),    # running max
            pltpu.VMEM((1, nj), jnp.float32),    # running sum (un-normalized)
            pltpu.VMEM((C, nj), jnp.float32),    # attention accumulator (f32)
            pltpu.VMEM((C8, nj), mxu_dtype),     # cached key projection g_j
        ],
        compiler_params=pltpu.CompilerParams(
            dimension_semantics=("parallel", "parallel", "arbitrary"),
            vmem_limit_bytes=48 * 1024 * 1024),
        cost_estimate=cost,
    )(gamma_s, nvalid, x_flat, x_flat, w_vq, wk_m)

    return out[:, :, :N].reshape(B, C, H, W)


def make_spectral_conv1d_weight(key, n_out, n_in):
    """kaiming_normal_ init (fan_in, gain=sqrt(2)) for a ks=1 conv, then spectral norm."""
    std = math.sqrt(2.0 / n_in)
    w = std * jax.random.normal(key, (n_out, n_in), dtype=jnp.float32)
    # TODO(synk): PyTorch spectral_norm uses a 1-step power iteration with a random u
    # vector; here we use the exact largest singular value (same semantics in the limit).
    sigma = jnp.linalg.svd(w, compute_uv=False)[0]
    return w / sigma


def self_attention_ref(x, wq, wk, wv, gamma):
    """Pure-JAX (f32) reference of the PyTorch forward."""
    B, C, H, W = x.shape
    xf = x.reshape(B, C, H * W)
    f = jnp.einsum("oc,bcn->bon", wq, xf)
    g = jnp.einsum("oc,bcn->bon", wk, xf)
    h = jnp.einsum("oc,bcn->bon", wv, xf)
    s = jnp.einsum("bci,bcj->bij", f, g)
    beta = jax.nn.softmax(s, axis=1)            # torch F.softmax(dim=1)
    o = gamma.reshape(()) * jnp.einsum("bcn,bnj->bcj", h, beta) + xf
    return o.reshape(B, C, H, W)


if __name__ == "__main__":
    key = jax.random.PRNGKey(0)
    kx, kq, kk, kv = jax.random.split(key, 4)

    B, C, H, W = 2, 32, 16, 16     # N = 256 -> grid (2, 2, 2) with 128-tiles
    x = jax.random.normal(kx, (B, C, H, W), dtype=jnp.float32)

    wq = make_spectral_conv1d_weight(kq, C // 8, C)
    wk = make_spectral_conv1d_weight(kk, C // 8, C)
    wv = make_spectral_conv1d_weight(kv, C, C)
    # module initializes gamma=0; use a nonzero value so the attention path is exercised
    gamma = jnp.array([[0.5]], dtype=jnp.float32)

    model = SequentialExPallas(
        lambda t: self_attention(t, wq, wk, wv, gamma, block_j=128, block_i=128))
    out = jax.block_until_ready(model(x))

    ref = self_attention_ref(x, wq, wk, wv, gamma)
    assert out.shape == (B, C, H, W)
    err = float(jnp.max(jnp.abs(out - ref)))
    assert jnp.allclose(out, ref, atol=2e-2, rtol=2e-2), f"max abs err {err}"

    print("KERNEL_OK")
</pallas_src>

<mosaic_0001>
module attributes {stable_mosaic.version = 11 : i64} {
  func.func @self_attn_kernel(%arg0: i32, %arg1: i32, %arg2: i32, %arg3: memref<1xf32, #tpu.memory_space<smem>>, %arg4: memref<1xi32, #tpu.memory_space<smem>>, %arg5: memref<1x32x128xf32, #tpu.memory_space<vmem>>, %arg6: memref<1x32x128xf32, #tpu.memory_space<vmem>>, %arg7: memref<36x32xbf16, #tpu.memory_space<vmem>>, %arg8: memref<4x32xbf16, #tpu.memory_space<vmem>>, %arg9: memref<1x32x128xf32, #tpu.memory_space<vmem>>, %arg10: memref<1x128xf32, #tpu.memory_space<vmem>>, %arg11: memref<1x128xf32, #tpu.memory_space<vmem>>, %arg12: memref<32x128xf32, #tpu.memory_space<vmem>>, %arg13: memref<4x128xbf16, #tpu.memory_space<vmem>>) attributes {dimension_semantics = [#tpu.dimension_semantics<parallel>, #tpu.dimension_semantics<parallel>, #tpu.dimension_semantics<arbitrary>], iteration_bounds = array<i64: 2, 2, 2>, scalar_prefetch = 0 : i64, scratch_operands = 4 : i64, tpu.core_type = #tpu.core_type<tc>, window_params = [{transform_indices = @transform_0, window_bounds = array<i64: 1>}, {transform_indices = @transform_1, window_bounds = array<i64: 1>}, {transform_indices = @transform_2, window_bounds = array<i64: 1, 32, 128>}, {transform_indices = @transform_3, window_bounds = array<i64: 1, 32, 128>}, {pipeline_mode = #tpu.pipeline_mode<synchronous>, transform_indices = @transform_4, window_bounds = array<i64: 36, 32>}, {pipeline_mode = #tpu.pipeline_mode<synchronous>, transform_indices = @transform_5, window_bounds = array<i64: 4, 32>}, {transform_indices = @transform_6, window_bounds = array<i64: 1, 32, 128>}]} {
    %c0_i32 = arith.constant 0 : i32
    %0 = arith.cmpi eq, %arg2, %c0_i32 : i32
    %1 = arith.extui %0 : i1 to i32
    %c0_i32_0 = arith.constant 0 : i32
    %2 = arith.cmpi ne, %1, %c0_i32_0 : i32
    scf.if %2 {
      %cst_26 = arith.constant -1.000000e+30 : f32
      %49 = vector.broadcast %cst_26 : f32 to vector<1x128xf32>
      %c0_27 = arith.constant 0 : index
      %c0_28 = arith.constant 0 : index
      %50 = vector.load %arg10[%c0_27, %c0_28] : memref<1x128xf32, #tpu.memory_space<vmem>>, vector<1x128xf32>
      tpu.vector_store %arg10[%c0_27, %c0_28], %49 {strides = array<i32>} : memref<1x128xf32, #tpu.memory_space<vmem>>, vector<1x128xf32>,
      %cst_29 = arith.constant 0.000000e+00 : f32
      %51 = vector.broadcast %cst_29 : f32 to vector<1x128xf32>
      %c0_30 = arith.constant 0 : index
      %c0_31 = arith.constant 0 : index
      %52 = vector.load %arg11[%c0_30, %c0_31] : memref<1x128xf32, #tpu.memory_space<vmem>>, vector<1x128xf32>
      tpu.vector_store %arg11[%c0_30, %c0_31], %51 {strides = array<i32>} : memref<1x128xf32, #tpu.memory_space<vmem>>, vector<1x128xf32>,
      %cst_32 = arith.constant 0.000000e+00 : f32
      %53 = vector.broadcast %cst_32 : f32 to vector<32x128xf32>
      %c0_33 = arith.constant 0 : index
      %c0_34 = arith.constant 0 : index
      %54 = vector.load %arg12[%c0_33, %c0_34] : memref<32x128xf32, #tpu.memory_space<vmem>>, vector<32x128xf32>
      tpu.vector_store %arg12[%c0_33, %c0_34], %53 {strides = array<i32>} : memref<32x128xf32, #tpu.memory_space<vmem>>, vector<32x128xf32>,
      %c0_35 = arith.constant 0 : index
      %c0_36 = arith.constant 0 : index
      %c0_37 = arith.constant 0 : index
      %55 = vector.load %arg5[%c0_35, %c0_36, %c0_37] : memref<1x32x128xf32, #tpu.memory_space<vmem>>, vector<1x32x128xf32>
      %56 = vector.shape_cast %55 : vector<1x32x128xf32> to vector<32x128xf32>
      %57 = arith.truncf %56 : vector<32x128xf32> to vector<32x128xbf16>
      %c0_38 = arith.constant 0 : index
      %c0_39 = arith.constant 0 : index
      %58 = vector.load %arg8[%c0_38, %c0_39] : memref<4x32xbf16, #tpu.memory_space<vmem>>, vector<4x32xbf16>
      %cst_40 = arith.constant dense<0.000000e+00> : vector<4x128xf32>
      %59 = tpu.matmul %58, %57, %cst_40 {dimension_numbers = #tpu.dot_dimension_numbers<[1], [0], [0], [1], [0, 0, 1, 1], [], []>} : vector<4x32xbf16>, vector<32x128xbf16>, vector<4x128xf32> -> vector<4x128xf32>
      %60 = arith.truncf %59 : vector<4x128xf32> to vector<4x128xbf16>
      %c0_41 = arith.constant 0 : index
      %c0_42 = arith.constant 0 : index
      %61 = vector.load %arg13[%c0_41, %c0_42] : memref<4x128xbf16, #tpu.memory_space<vmem>>, vector<4x128xbf16>
      tpu.vector_store %arg13[%c0_41, %c0_42], %60 {strides = array<i32>} : memref<4x128xbf16, #tpu.memory_space<vmem>>, vector<4x128xbf16>,
    } else {
    }
    %c0 = arith.constant 0 : index
    %c0_1 = arith.constant 0 : index
    %c0_2 = arith.constant 0 : index
    %3 = vector.load %arg6[%c0, %c0_1, %c0_2] : memref<1x32x128xf32, #tpu.memory_space<vmem>>, vector<1x32x128xf32>
    %4 = vector.shape_cast %3 : vector<1x32x128xf32> to vector<32x128xf32>
    %5 = arith.truncf %4 : vector<32x128xf32> to vector<32x128xbf16>
    %c0_3 = arith.constant 0 : index
    %c0_4 = arith.constant 0 : index
    %6 = vector.load %arg7[%c0_3, %c0_4] : memref<36x32xbf16, #tpu.memory_space<vmem>>, vector<36x32xbf16>
    %cst = arith.constant dense<0.000000e+00> : vector<36x128xf32>
    %7 = tpu.matmul %6, %5, %cst {dimension_numbers = #tpu.dot_dimension_numbers<[1], [0], [0], [1], [0, 0, 1, 1], [], []>} : vector<36x32xbf16>, vector<32x128xbf16>, vector<36x128xf32> -> vector<36x128xf32>
    %8 = vector.extract_strided_slice %7 {offsets = [0, 0], sizes = [32, 128], strides = [1, 1]} : vector<36x128xf32> to vector<32x128xf32>
    %9 = arith.truncf %8 : vector<32x128xf32> to vector<32x128xbf16>
    %10 = vector.extract_strided_slice %7 {offsets = [32, 0], sizes = [4, 128], strides = [1, 1]} : vector<36x128xf32> to vector<4x128xf32>
    %11 = arith.truncf %10 : vector<4x128xf32> to vector<4x128xbf16>
    %c0_5 = arith.constant 0 : index
    %c0_6 = arith.constant 0 : index
    %12 = vector.load %arg13[%c0_5, %c0_6] : memref<4x128xbf16, #tpu.memory_space<vmem>>, vector<4x128xbf16>
    %cst_7 = arith.constant dense<0.000000e+00> : vector<128x128xf32>
    %13 = tpu.matmul %11, %12, %cst_7 {dimension_numbers = #tpu.dot_dimension_numbers<[0], [0], [1], [1], [0, 1, 1, 1], [], []>} : vector<4x128xbf16>, vector<4x128xbf16>, vector<128x128xf32> -> vector<128x128xf32>
    %c128_i32 = arith.constant 128 : i32
    %14 = arith.muli %arg2, %c128_i32 : i32
    %15 = tpu.iota {dimensions = array<i32: 0>} : vector<128x128xi32>
    %16 = vector.broadcast %14 : i32 to vector<128x128xi32>
    %17 = arith.addi %16, %15 : vector<128x128xi32>
    %c0_8 = arith.constant 0 : index
    %18 = memref.load %arg4[%c0_8] : memref<1xi32, #tpu.memory_space<smem>>
    %19 = vector.broadcast %18 : i32 to vector<128x128xi32>
    %20 = arith.cmpi slt, %17, %19 : vector<128x128xi32>
    %cst_9 = arith.constant -1.000000e+30 : f32
    %21 = vector.broadcast %cst_9 : f32 to vector<128x128xf32>
    %22 = arith.select %20, %13, %21 : vector<128x128xi1>, vector<128x128xf32>
    %c0_10 = arith.constant 0 : index
    %c0_11 = arith.constant 0 : index
    %23 = vector.load %arg10[%c0_10, %c0_11] : memref<1x128xf32, #tpu.memory_space<vmem>>, vector<1x128xf32>
    %cst_12 = arith.constant dense<0xFF800000> : vector<128xf32>
    %24 = vector.multi_reduction <maximumf>, %22, %cst_12 [0] : vector<128x128xf32> to vector<128xf32>
    %25 = vector.shape_cast %24 : vector<128xf32> to vector<1x128xf32>
    %26 = arith.maximumf %23, %25 : vector<1x128xf32>
    %27 = arith.subf %23, %26 : vector<1x128xf32>
    %28 = math.exp %27 : vector<1x128xf32>
    %29 = vector.broadcast %26 : vector<1x128xf32> to vector<128x128xf32>
    %30 = arith.subf %22, %29 : vector<128x128xf32>
    %31 = math.exp %30 : vector<128x128xf32>
    %c0_13 = arith.constant 0 : index
    %c0_14 = arith.constant 0 : index
    %32 = vector.load %arg11[%c0_13, %c0_14] : memref<1x128xf32, #tpu.memory_space<vmem>>, vector<1x128xf32>
    %33 = arith.mulf %28, %32 : vector<1x128xf32>
    %cst_15 = arith.constant dense<0.000000e+00> : vector<128xf32>
    %34 = vector.multi_reduction <add>, %31, %cst_15 [0] : vector<128x128xf32> to vector<128xf32>
    %35 = vector.shape_cast %34 : vector<128xf32> to vector<1x128xf32>
    %36 = arith.addf %33, %35 : vector<1x128xf32>
    %c0_16 = arith.constant 0 : index
    %c0_17 = arith.constant 0 : index
    %37 = vector.load %arg11[%c0_16, %c0_17] : memref<1x128xf32, #tpu.memory_space<vmem>>, vector<1x128xf32>
    tpu.vector_store %arg11[%c0_16, %c0_17], %36 {strides = array<i32>} : memref<1x128xf32, #tpu.memory_space<vmem>>, vector<1x128xf32>,
    %c0_18 = arith.constant 0 : index
    %c0_19 = arith.constant 0 : index
    %38 = vector.load %arg12[%c0_18, %c0_19] : memref<32x128xf32, #tpu.memory_space<vmem>>, vector<32x128xf32>
    %39 = vector.broadcast %28 : vector<1x128xf32> to vector<32x128xf32>
    %40 = arith.mulf %39, %38 : vector<32x128xf32>
    %41 = arith.truncf %31 : vector<128x128xf32> to vector<128x128xbf16>
    %cst_20 = arith.constant dense<0.000000e+00> : vector<32x128xf32>
    %42 = tpu.matmul %9, %41, %cst_20 {dimension_numbers = #tpu.dot_dimension_numbers<[1], [0], [0], [1], [0, 0, 1, 1], [], []>} : vector<32x128xbf16>, vector<128x128xbf16>, vector<32x128xf32> -> vector<32x128xf32>
    %43 = arith.addf %40, %42 : vector<32x128xf32>
    %c0_21 = arith.constant 0 : index
    %c0_22 = arith.constant 0 : index
    %44 = vector.load %arg12[%c0_21, %c0_22] : memref<32x128xf32, #tpu.memory_space<vmem>>, vector<32x128xf32>
    tpu.vector_store %arg12[%c0_21, %c0_22], %43 {strides = array<i32>} : memref<32x128xf32, #tpu.memory_space<vmem>>, vector<32x128xf32>,
    %c0_23 = arith.constant 0 : index
    %c0_24 = arith.constant 0 : index
    %45 = vector.load %arg10[%c0_23, %c0_24] : memref<1x128xf32, #tpu.memory_space<vmem>>, vector<1x128xf32>
    tpu.vector_store %arg10[%c0_23, %c0_24], %26 {strides = array<i32>} : memref<1x128xf32, #tpu.memory_space<vmem>>, vector<1x128xf32>,
    %c1_i32 = arith.constant 1 : i32
    %46 = arith.cmpi eq, %arg2, %c1_i32 : i32
    %47 = arith.extui %46 : i1 to i32
    %c0_i32_25 = arith.constant 0 : i32
    %48 = arith.cmpi ne, %47, %c0_i32_25 : i32
    scf.if %48 {
      %c0_26 = arith.constant 0 : index
      %c0_27 = arith.constant 0 : index
      %49 = vector.load %arg11[%c0_26, %c0_27] : memref<1x128xf32, #tpu.memory_space<vmem>>, vector<1x128xf32>
      %50 = tpu.reciprocal %49 {approx = true} : vector<1x128xf32> -> vector<1x128xf32>
      %c0_28 = arith.constant 0 : index
      %51 = memref.load %arg3[%c0_28] : memref<1xf32, #tpu.memory_space<smem>>
      %c0_29 = arith.constant 0 : index
      %c0_30 = arith.constant 0 : index
      %52 = vector.load %arg12[%c0_29, %c0_30] : memref<32x128xf32, #tpu.memory_space<vmem>>, vector<32x128xf32>
      %53 = vector.broadcast %50 : vector<1x128xf32> to vector<32x128xf32>
      %54 = arith.mulf %52, %53 : vector<32x128xf32>
      %55 = vector.broadcast %51 : f32 to vector<32x128xf32>
      %56 = arith.mulf %55, %54 : vector<32x128xf32>
      %c0_31 = arith.constant 0 : index
      %c0_32 = arith.constant 0 : index
      %c0_33 = arith.constant 0 : index
      %57 = vector.load %arg5[%c0_31, %c0_32, %c0_33] : memref<1x32x128xf32, #tpu.memory_space<vmem>>, vector<1x32x128xf32>
      %58 = vector.shape_cast %57 : vector<1x32x128xf32> to vector<32x128xf32>
      %59 = arith.addf %56, %58 : vector<32x128xf32>
      %c0_34 = arith.constant 0 : index
      %c0_35 = arith.constant 0 : index
      %c0_36 = arith.constant 0 : index
      %60 = vector.load %arg9[%c0_34, %c0_35, %c0_36] : memref<1x32x128xf32, #tpu.memory_space<vmem>>, vector<1x32x128xf32>
      %61 = vector.shape_cast %60 : vector<1x32x128xf32> to vector<32x128xf32>
      %62 = vector.shape_cast %59 : vector<32x128xf32> to vector<1x32x128xf32>
      tpu.vector_store %arg9[%c0_34, %c0_35, %c0_36], %62 {strides = array<i32>} : memref<1x32x128xf32, #tpu.memory_space<vmem>>, vector<1x32x128xf32>,
    } else {
    }
    return
  }
  func.func @transform_0(%arg0: i32, %arg1: i32, %arg2: i32) -> i32 {
    %c0_i32 = arith.constant 0 : i32
    %c0_i32_0 = arith.constant 0 : i32
    return %c0_i32 : i32
  }
  func.func @transform_1(%arg0: i32, %arg1: i32, %arg2: i32) -> i32 {
    %c0_i32 = arith.constant 0 : i32
    %c0_i32_0 = arith.constant 0 : i32
    return %c0_i32 : i32
  }
  func.func @transform_2(%arg0: i32, %arg1: i32, %arg2: i32) -> (i32, i32, i32) {
    %c0_i32 = arith.constant 0 : i32
    %c0_i32_0 = arith.constant 0 : i32
    return %arg0, %c0_i32, %arg1 : i32, i32, i32
  }
  func.func @transform_3(%arg0: i32, %arg1: i32, %arg2: i32) -> (i32, i32, i32) {
    %c0_i32 = arith.constant 0 : i32
    %c0_i32_0 = arith.constant 0 : i32
    return %arg0, %c0_i32, %arg2 : i32, i32, i32
  }
  func.func @transform_4(%arg0: i32, %arg1: i32, %arg2: i32) -> (i32, i32) {
    %c0_i32 = arith.constant 0 : i32
    %c0_i32_0 = arith.constant 0 : i32
    %c0_i32_1 = arith.constant 0 : i32
    return %c0_i32, %c0_i32_0 : i32, i32
  }
  func.func @transform_5(%arg0: i32, %arg1: i32, %arg2: i32) -> (i32, i32) {
    %c0_i32 = arith.constant 0 : i32
    %c0_i32_0 = arith.constant 0 : i32
    %c0_i32_1 = arith.constant 0 : i32
    return %c0_i32, %c0_i32_0 : i32, i32
  }
  func.func @transform_6(%arg0: i32, %arg1: i32, %arg2: i32) -> (i32, i32, i32) {
    %c0_i32 = arith.constant 0 : i32
    %c0_i32_0 = arith.constant 0 : i32
    return %arg0, %c0_i32, %arg1 : i32, i32, i32
  }
}

</mosaic_0001>

<bundles_post_ra>
// kernel: tpu_custom_call.1
= control target key start
LH: loop header
LB: loop body
LE: loop exit
PB: predicated region body
PF: predicated region fallthrough
CT: control target
= control target key end

     0   :  { %s2163_s0 = inlined_call_operand.<no memory space> [shape: f32[1], index: 0, kind: input, shape index: {}]   ;;  %s2164_s1 = inlined_call_operand.<no memory space> [shape: s32[1], index: 1, kind: input, shape index: {}]   ;;  %s2165_s2 = inlined_call_operand.hbm [shape: f32[2,32,256], index: 2, kind: input, shape index: {}]   ;;  %s2166_s3 = inlined_call_operand.hbm [shape: f32[2,32,256], index: 3, kind: input, shape index: {}]   ;;  %s2167_s4 = inlined_call_operand.vmem [shape: bf16[36,32], index: 4, kind: input, shape index: {}]   ;;  %s2168_s5 = inlined_call_operand.vmem [shape: bf16[4,32], index: 5, kind: input, shape index: {}]   ;;  %s2169_s6 = inlined_call_operand.hbm [shape: f32[2,32,256], index: 6, kind: output, shape index: {}]  }
   0x1   :  { %2187 = sst [smem:[#allocation24_spill]] %s2165_s2 }
   0x2   :  { %2188 = sst [smem:[#allocation25_spill]] %s2169_s6 }
   0x3   :  { %11 = sst [smem:[#allocation6]] %s2163_s0 }
   0x4   :  { %12 = sst [smem:[#allocation7]] %s2164_s1 }
   0x5   :  { %13 = vsyncpa [#allocation9], 0 }
   0x6   :  { %15 = vsyncpa [#allocation9 + $0x1], 0 }
   0x7   :  { %16 = vsyncpa [#allocation12], 0 }
   0x8   :  { %18 = vsyncpa [#allocation12 + $0x1], 0 }
   0x9   :  { %19 = vsyncpa [#allocation10], 0 }
   0xa   :  { %21 = vsyncpa [#allocation10 + $0x1], 0  ;;  %s1625_s25 = smov 0   ;;  %s1627_s26 = smov 0  }
   0xb   :  { %s1629_s27 = smov 0   ;;  %s1631_s28 = smov 0  }
   0xc   :  { %s1633_s29 = smov 0   ;;  %s1635_s0 = smov 0  }
   0xd   :  { %s1637_s30 = smov 0   ;;  %s1639_s1 = smov 0  }
   0xe   :  { %s1641_s7 = smov 0   ;;  %s1643_s8 = smov 0  }
   0xf   :  { %s1645_s9 = smov 0   ;;  %s1647_s10 = smov 0  }
  0x10   :  { %s1649_s11 = smov 0  }
  0x11 LB: > { %2189 = sst [smem:[#allocation17_spill]] %s1532_s28  ;;  %s1065_s12 = sadd.s32 4294967295, %s1568_s11   ;;  %s1568_s11 = sphi %s1649_s11, %s27_s11   ;;  %s1564_s10 = sphi %s1647_s10, %s2237_s10   ;;  %s1560_s9 = sphi %s1645_s9, %s2228_s9   ;;  %s1556_s8 = sphi %s1643_s8, %s2227_s8   ;;  %s1552_s7 = sphi %s1641_s7, %s2236_s7   ;;  %s1548_s1 = sphi %s1639_s1, %s2226_s1   ;;  %s1544_s30 = sphi %s1637_s30, %s2225_s30   ;;  %s1540_s0 = sphi %s1635_s0, %s2235_s0   ;;  %s1536_s29 = sphi %s1633_s29, %s2234_s29   ;;  %s1532_s28 = sphi %s1631_s28, %s2233_s28   ;;  %s1528_s27 = sphi %s1629_s27, %s2232_s27   ;;  %s1524_s26 = sphi %s1627_s26, %s2231_s26   ;;  %s1520_s25 = sphi %s1625_s25, %s2230_s25  }
  0x12   : > { %2190 = sst [smem:[#allocation18_spill]] %s1556_s8  ;;  %s1066_s13 = sadd.s32 4294967294, %s1568_s11  }
  0x13   : > { %2191 = sst [smem:[#allocation19_spill]] %s1560_s9  ;;  %p104_p0 = scmp.ne.s32.totalorder %s1540_s0, %s1536_s29 }
  0x14   : > { %p2174_p1 = scmp.eq.s32.totalorder %s1568_s11, 0  ;;  %p110_p2 = scmp.ne.s32.totalorder %s1536_s29, %s1532_s28 }
  0x15   : > { %p1699_p3 = scmp.eq.s32.totalorder %s1065_s12, 0  ;;  %p206_p4 = scmp.eq.s32.totalorder %s1065_s12, 7 }
  0x16   : > { %p1705_p5 = por %p2174_p1, %p104_p0  ;;  %p212_p6 = scmp.eq.s32.totalorder %s1066_s13, 7 }
  0x17   : > { %p1711_p7 = por %p1699_p3, %p110_p2  ;;  %p1715_p8 = por %p206_p4, %p104_p0 }
  0x18   : > { %p1719_p9 = por %p212_p6, %p110_p2  ;;  %p2173_p10 = scmp.lt.s32.totalorder %s1568_s11, 8 }
  0x19   : > { %s2194_s18 = scalar_select %p1711_p7, 1, 0 }
  0x1a   : > { %s2195_s19 = scalar_select %p1715_p8, 1, 0 }
  0x1b   : > { %s2197_s20 = scalar_select %p1719_p9, 1, 0 }
  0x1c   : > { %2196 = sst [smem:[#allocation20_spill]] %s2195_s19  ;;  %s244_s21 = sand.u32 1, %s1540_s0  }
  0x1d   : > { %2198 = sst [smem:[#allocation21_spill]] %s2197_s20  ;;  %s1069_s22 = sshll.u32 %s244_s21, 5 }
  0x1e   : > { %s1070_s23 = sshll.u32 %s1564_s10, 3  ;;  %s248_s12 = scalar_lea.vmem [#allocation8], %s1069_s22 }
  0x1f   : > { %s253_s24 = sadd.s32 %s1560_s9, %s1070_s23  ;;  %s256_s13 = sshll.u32 %s248_s12, 4  ;;  %s1729_s13 = int_to_ptr.vmem [resolvable:$true] %s256_s13 }
  0x20   : > { %s1071_s15 = sshll.u32 %s253_s24, 7  ;;  %s2199_s2 = sld [smem:[#allocation24_spill]] }
  0x21   : > { %p1740_p11 = pnand %p2173_p10, %p1705_p5  ;;  %s1744_s22 = scalar_lea.sflag [#allocation9], %s244_s21 }
  0x23   : > { %p1368_p13 = pneg %p1740_p11 }
  0x26   : > { %s1734_s6 = scalar_lea.hbm %s2199_s2, %s1071_s15  ;;  %s1371_s15 = scalar_lea.hbm %s2199_s2, 2048 }
  0x27   : > { %s1366_s24 = scalar_lea.hbm %s1734_s6, 512  ;;  %p1372_p4 = scmp.lt.u32.totalorder %s1734_s6, %s2199_s2 }
  0x28   : > { %p1367_p12 = scmp.ne.s32.totalorder %s1734_s6, %s1366_s24  ;;  %p1373_p5 = scmp.lt.u32.totalorder %s1371_s15, %s1366_s24 }
  0x29   : > { %p1375_p10 = scmp.lt.u32.totalorder %s1366_s24, %s1734_s6 }
  0x2a   : > { %p1369_p0 = pnand %p1368_p13, %p1367_p12  ;;  %p1374_p6 = por %p1373_p5, %p1372_p4 }
  0x2c   : > { %p1370_p2 = pneg %p1369_p0  ;;  %p1376_p1 = por %p1375_p10, %p1374_p6 }
  0x2e   : > { %p1377_p9 = pnand %p1376_p1, %p1370_p2 }
  0x30   : > { %1380 = shalt.err (!%p1377_p9)
}
  0x31   : > { %s1381_s21 = scalar_lea.vmem %s1729_s13, 512  ;;  %s1570_s28 = smov [#allocation8]  }
  0x32   : > { %p1382_p12 = scmp.ne.s32.totalorder %s1729_s13, %s1381_s21  ;;  %s1386_s14 = sshll.u32 %s1570_s28, 4  ;;  %s1387_s14 = int_to_ptr.vmem [resolvable:$false] %s1386_s14 }
  0x33   : > { %s1388_s17 = scalar_lea.vmem %s1387_s14, 1024  ;;  %p1389_p7 = scmp.lt.s32.totalorder %s1729_s13, %s1387_s14 }
  0x34   : > { %p1384_p0 = pnand %p1382_p12, %p1368_p13  ;;  %p1390_p4 = scmp.lt.s32.totalorder %s1388_s17, %s1381_s21 }
  0x36   : > { %p1385_p8 = pneg %p1384_p0  ;;  %p1391_p5 = por %p1390_p4, %p1389_p7 }
  0x38   : > { %p1392_p10 = pnand %p1391_p5, %p1385_p8 }
  0x3a   : > { %1395 = shalt.err (!%p1392_p10)
}
  0x3b   : > { %s2177_s24 = smov 256   ;;  %s2178_s15 = smov 128  }
  0x3c   : > { %s2179_s12 = smov 8   ;;  %p1075_p1 = scmp.ge.s32.totalorder %s1568_s11, 1 }
  0x3d   : > { %1201 = dma.hbm_to_vmem [thread:$0]  (!%p1740_p11), %s1734_s6, 512, %s1729_s13, %s1744_s22, %s2177_s24, %s2178_s15, %s2179_s12  }
  0x3e   : > { %p286_p7 = scmp.lt.s32.totalorder %s1568_s11, 9  ;;  %s39_s14 = sadd.s32 1, %s1556_s8 }
  0x3f   : > { %p40_p9 = scmp.ge.s32.totalorder %s39_s14, 2  ;;  %p138_p13 = scmp.ne.s32.totalorder %s1524_s26, %s1520_s25 }
  0x40   : > { %p1778_p8 = pnand %p1075_p1, %p286_p7  ;;  %s2203_s6 = sadd.s32 1, %s1560_s9 }
  0x41   : > { %s2239_s14 = smov (%p40_p9, %s39_s14), 0  ;;  %s2241_s6 = smov (!%p40_p9, %s2203_s6), %s1560_s9 }
  0x42   : > { %2202 = sst [smem:[#allocation22_spill]] %s2239_s14  ;;  %s121_s13 = ssub.s32 %s1556_s8, %s2239_s14 }
  0x43   : > { %p132_p11 = scmp.ne.s32.totalorder %s1528_s27, %s1524_s26  ;;  %p44_p2 = scmp.ge.s32.totalorder %s2241_s6, 2 }
  0x44   : > { %p1797_p6 = por %p138_p13, %p1699_p3  ;;  %s266_s17 = sand.u32 1, %s1528_s27  }
  0x45   : > { %s275_s24 = sadd.s32 %s1556_s8, %s1070_s23  ;;  %s2243_s6 = smov (%p44_p2, %s2241_s6), 0 }
  0x46   : > { %s2204_s22 = scalar_select %p1797_p6, 1, 0 }
  0x47   : > { %2205 = sst [smem:[#allocation23_spill]] %s2243_s6  ;;  %s2206_s25 = sadd.s32 1, %s1564_s10 }
  0x48   : > { %s2245_s25 = smov (!%p44_p2, %s2206_s25), %s1564_s10  ;;  %s93_s15 = ssub.s32 %s1560_s9, %s2243_s6 }
  0x49   : > { %p2207_p12 = scmp.eq.s32.totalorder %s1568_s11, 0  ;;  %p48_p3 = scmp.ge.s32.totalorder %s2245_s25, 2 }
  0x4a   : > { %s1072_s16 = sshll.u32 %s266_s17, 5  ;;  %s1074_s23 = sshll.u32 %s275_s24, 7 }
  0x4b   : > { %p1814_p0 = por %p132_p11, %p2207_p12  ;;  %s2247_s25 = smov (%p48_p3, %s2245_s25), 0 }
  0x4c   : > { %s1823_s2 = scalar_lea.hbm %s2166_s3, %s1074_s23  ;;  %s92_s6 = ssub.s32 %s1564_s10, %s2247_s25 }
  0x4d   : > { %s270_s14 = scalar_lea.vmem [#allocation11], %s1072_s16  ;;  %s94_s8 = sor.u32 %s93_s15, %s92_s6 }
  0x4e   : > { %s278_s9 = sshll.u32 %s270_s14, 4  ;;  %s122_s19 = sor.u32 %s121_s13, %s92_s6  ;;  %s1827_s9 = int_to_ptr.vmem [resolvable:$true] %s278_s9 }
  0x4f   : > { %p95_p4 = scmp.eq.s32.totalorder %s94_s8, 0  ;;  %p123_p5 = scmp.eq.s32.totalorder %s122_s19, 0 }
  0x50   : > { %p2209_p10 = scmp.lt.s32.totalorder %s1568_s11, 8  ;;  %s2211_s21 = sadd.s32 1, %s1540_s0 }
  0x51   : > { %s1840_s20 = scalar_select %p95_p4, %s1540_s0, %s2211_s21  }
  0x52   : > { %p1833_p1 = pnand %p2209_p10, %p1814_p0  ;;  %s2212_s14 = sadd.s32 1, %s1528_s27 }
  0x53   : > { %s1845_s16 = scalar_select %p123_p5, %s1528_s27, %s2212_s14  }
  0x54   : > { %s1847_s15 = scalar_lea.sflag [#allocation12], %s266_s17  ;;  %s1396_s8 = scalar_lea.hbm %s1823_s2, 512 }
  0x55   : > { %p1397_p7 = scmp.ne.s32.totalorder %s1823_s2, %s1396_s8  ;;  %p1398_p9 = pneg %p1833_p1 }
  0x56   : > { %s1401_s6 = scalar_lea.hbm %s2166_s3, 2048  ;;  %p1402_p2 = scmp.lt.u32.totalorder %s1823_s2, %s2166_s3 }
  0x57   : > { %p1399_p13 = pnand %p1398_p9, %p1397_p7  ;;  %p1403_p12 = scmp.lt.u32.totalorder %s1401_s6, %s1396_s8 }
  0x58   : > { %p1405_p3 = scmp.lt.u32.totalorder %s1396_s8, %s1823_s2 }
  0x59   : > { %p1400_p11 = pneg %p1399_p13  ;;  %p1404_p0 = por %p1403_p12, %p1402_p2 }
  0x5b   : > { %p1406_p4 = por %p1405_p3, %p1404_p0 }
  0x5d   : > { %p1407_p5 = pnand %p1406_p4, %p1400_p11 }
  0x5f   : > { %1410 = shalt.err (!%p1407_p5)
}
  0x60   : > { %s1411_s17 = scalar_lea.vmem %s1827_s9, 512  ;;  %s1574_s21 = smov [#allocation11]  }
  0x61   : > { %p1412_p10 = scmp.ne.s32.totalorder %s1827_s9, %s1411_s17  ;;  %s1416_s14 = sshll.u32 %s1574_s21, 4  ;;  %s1417_s14 = int_to_ptr.vmem [resolvable:$false] %s1416_s14 }
  0x62   : > { %s1418_s19 = scalar_lea.vmem %s1417_s14, 1024  ;;  %p1419_p6 = scmp.lt.s32.totalorder %s1827_s9, %s1417_s14 }
  0x63   : > { %p1414_p7 = pnand %p1412_p10, %p1398_p9  ;;  %p1420_p2 = scmp.lt.s32.totalorder %s1418_s19, %s1411_s17 }
  0x65   : > { %p1415_p13 = pneg %p1414_p7  ;;  %p1421_p12 = por %p1420_p2, %p1419_p6 }
  0x67   : > { %p1422_p0 = pnand %p1421_p12, %p1415_p13 }
  0x69   : > { %1425 = shalt.err (!%p1422_p0)
}
  0x6a   : > { %s2213_s8 = smov 8   ;;  %s2214_s12 = smov 128  }
  0x6b   : > { %s2215_s6 = smov 256   ;;  %290 = sbr.rel (%p1778_p8) target bundleno = 1267 (0x4f3), region = 44 }
  0x6c   : > { %1204 = dma.hbm_to_vmem [thread:$0]  (!%p1833_p1), %s1823_s2, 512, %s1827_s9, %s1847_s15, %s2215_s6, %s2214_s12, %s2213_s8  }
  0x6d   : > { %s1881_s13 = sand.u32 (!%p1778_p8), 1, %s1536_s29   ;;  %p2216_p6 = scmp.ne.s32.totalorder (!%p1778_p8), %s2194_s18, 0 }
  0x6e   : > { %s1076_s23 = sshll.u32 (!%p1778_p8), %s1881_s13, 5  ;;  %s293_s17 = scalar_lea.sflag (!%p1778_p8), [#allocation9], %s1881_s13 }
  0x6f   : > { %s1885_s21 = scalar_lea.vmem (!%p1778_p8), [#allocation8], %s1076_s23 }
  0x72   : > { %1507 = dma.done.wait (%p2216_p6), %s293_s17, 512  }
  0x73   : > { %1509 = vsyncadd (%p2216_p6), %s293_s17, 4294966784  ;;  %s301_s2 = sand.u32 1, %s1524_s26   ;;  %p2217_p8 = scmp.ne.s32.totalorder %s2204_s22, 0 }
  0x74   : > { %s1077_s9 = sshll.u32 %s301_s2, 5  ;;  %s302_s28 = scalar_lea.sflag [#allocation12], %s301_s2 }
  0x75   : > { %s1892_s24 = scalar_lea.vmem [#allocation11], %s1077_s9 }
  0x76   : > { %1511 = dma.done.wait (%p2217_p8), %s302_s28, 512  }
  0x77   : > { %1513 = vsyncadd (%p2217_p8), %s302_s28, 4294966784  ;;  %s1898_s15 = scalar_lea.vmem [#allocation13], %s1076_s23  ;;  %p1079_p1 = scmp.ne.s32.totalorder %s1544_s30, 0 }
  0x78   : > { %v350_v0 = vld [vmem:[%s1885_s21] sm:$0xff] (!%p1079_p1)  ;;  %v351_v1 = vld [vmem:[%s1885_s21 + $0x8] sm:$0xff] (!%p1079_p1)  ;;  %v352_v2 = vld [vmem:[%s1885_s21 + $0x10] sm:$0xff] (!%p1079_p1)  ;;  %v1575_v3 = vmov (!%p1079_p1), -1e+30   ;;  %v1576_v4 = vmov (!%p1079_p1), 0.0  }
  0x79   : > { %343 = sbr.rel (%p1079_p1) target bundleno = 345 (0x159), region = 56  ;;  %344 = vst [vmem:[#allocation2] sm:$0x1] (!%p1079_p1), %v1575_v3  ;;  %345 = vst [vmem:[#allocation3] sm:$0x1] (!%p1079_p1), %v1576_v4  ;;  %1129 = vmatprep.subr.bf16.mxu0 (!%p1079_p1), %v1576_v4  ;;  %v354_v5 = vpack.c.bf16 (!%p1079_p1), %v351_v1, %v350_v0  ;;  %v353_v6 = vld [vmem:[%s1885_s21 + $0x18] sm:$0xff] (!%p1079_p1) }
  0x7a   : > { %346 = vst [vmem:[#allocation4] sm:$0xff] (!%p1079_p1), %v1576_v4  ;;  %347 = vst [vmem:[#allocation4 + $0x8] sm:$0xff] (!%p1079_p1), %v1576_v4  ;;  %vm1577_vm0 = vmmov (!%p1079_p1), 0   ;;  %v355_v7 = vpack.c.bf16 (!%p1079_p1), %v353_v6, %v352_v2  ;;  %v356_v8 = vld [vmem:[%s2168_s5] sm:$0x3] (!%p1079_p1)  ;;  %vm357_vm1 = vcmask (!%p1079_p1), 261120  }
  0x7b   : > { %348 = vst [vmem:[#allocation4 + $0x10] sm:$0xff] (!%p1079_p1), %v1576_v4  ;;  %349 = vst [vmem:[#allocation4 + $0x18] sm:$0xff] (!%p1079_p1), %v1576_v4  ;;  %1133 = vmatprep.mubr.msk.bf16.mxu0 (!%p1079_p1), %vm1577_vm0, %v1576_v4  ;;  %1130 = vmatpush3.bf16.msra.mxu0 (!%p1079_p1), %v354_v5 }
  0x7c   : > { %1131 = vmatprep.subr.bf16.mxu0 (!%p1079_p1), %v1576_v4 }
  0x7f   : > { %1132 = vmatpush3.bf16.msra.mxu0 (!%p1079_p1), %v355_v7 }
  0x82   : > { %1134 = vmatmul.mubr.msk.bf16.vlgmr.msra.gmra.mrb[0].mxu0 %vm357_vm1, %v356_v8 }
 0x155   : > { %v395_v9 = vpop.f32.mrb[0].mxu0 }
 0x156   : > { %v401_v10 = vpack.c.bf16 %v395_v9, %v395_v9  ;;  %v1135_v11 = vpop.f32.mrb[1].mxu0 }
 0x157   : > { %v398_v12 = vpop.f32.mrb[2].mxu0 }
 0x158   : > { %402 = vst [vmem:[#allocation5] sm:$0x3] %v401_v10  ;;  %v1136_v13 = vpop.f32.mrb[3].mxu0 }
 0x159 PF: > { %v403_v14 = vld [vmem:[%s1892_s24] sm:$0xff]  ;;  %v404_v15 = vld [vmem:[%s1892_s24 + $0x8] sm:$0xff]  ;;  %v405_v16 = vld [vmem:[%s1892_s24 + $0x10] sm:$0xff]  ;;  %v1578_v17 = vmov 0.0   ;;  %vm1579_vm2 = vmmov 0   ;;  %vm427_vm3 = vcmask 261120   ;;  %v640_v49 = vlaneseq }
 0x15a   : > { %1137 = vmatprep.subr.bf16.mxu0 %v1578_v17  ;;  %v407_v18 = vpack.c.bf16 %v404_v15, %v403_v14  ;;  %v406_v19 = vld [vmem:[%s1892_s24 + $0x18] sm:$0xff]  ;;  %1141 = vmatprep.mubr.msk.bf16.mxu0 %vm1579_vm2, %v1578_v17  ;;  %v1328_v22 = vld [vmem:[%s2167_s4 + $0x8] sm:$0xff]   ;;  %v1329_v23 = vld [vmem:[%s2167_s4 + $0x10] ss:$0 sps:$4 sm:$0x33]   ;;  %vm538_vm4 = vcmask 1041408  }
 0x15b   : > { %v408_v20 = vpack.c.bf16 %v406_v19, %v405_v16  ;;  %v1327_v21 = vld [vmem:[%s2167_s4] sm:$0xff]   ;;  %vm513_vm5 = vcmask 31744   ;;  %v1935_v50 = vshrl.u32 %v640_v49, 7  ;;  %s674_s17 = sld [smem:[#allocation7]]  ;;  %s1095_s2 = sshll.u32 %s1544_s30, 7 }
 0x15c   : > { %1138 = vmatpush3.bf16.msra.mxu0 %v407_v18  ;;  %v1940_v53 = vstv %s1095_s2  ;;  %p1096_p9 = scmp.ne.s32.totalorder %s1544_s30, 1 }
 0x15d   : > { %1139 = vmatprep.subr.bf16.mxu0 %v1578_v17  ;;  %v643_v51 = vadd.s32 16, %v1935_v50  ;;  %v647_v52 = vadd.s32 48, %v1935_v50  ;;  %v645_v54 = vadd.s32 32, %v1935_v50  ;;  %v644_v56 = vadd.s32 24, %v1935_v50  ;;  %s899_s9 = sld [smem:[#allocation6]] (!%p1096_p9) }
 0x15e   : > { %v642_v57 = vadd.s32 8, %v1935_v50  ;;  %v648_v58 = vadd.s32 56, %v1935_v50  ;;  %v646_v60 = vadd.s32 40, %v1935_v50  ;;  %v658_v1 = vadd.s32 %v1940_v53, %v1935_v50 }
 0x15f   : > { %v496_v24 = vld [vmem:[#allocation5] sm:$0x3]  ;;  %v660_v61 = vadd.s32 %v1940_v53, %v643_v51  ;;  %v664_v63 = vadd.s32 %v1940_v53, %v647_v52  ;;  %v662_v3 = vadd.s32 %v1940_v53, %v645_v54  ;;  %v661_v4 = vadd.s32 %v1940_v53, %v644_v56 }
 0x160   : > { %1140 = vmatpush3.bf16.msra.mxu0 %v408_v20  ;;  %1191 = vmatprep.subr.msk.bf16.mxu1 %vm538_vm4, %v496_v24  ;;  %v540_v25 = vsel %vm538_vm4, %v496_v24, 0  ;;  %v659_v5 = vadd.s32 %v1940_v53, %v642_v57  ;;  %v665_v6 = vadd.s32 %v1940_v53, %v648_v58  ;;  %v663_v7 = vadd.s32 %v1940_v53, %v646_v60 }
 0x161   : > { %1154 = vmatpush3.bf16.msra.mxu1 %v540_v25  ;;  %v1949_v0 = vstv %s674_s17  ;;  %v651_v8 = vadd.s32 80, %v1935_v50  ;;  %v649_v9 = vadd.s32 64, %v1935_v50  ;;  %v652_v11 = vadd.s32 88, %v1935_v50 }
 0x162   : > { %vm678_vm6 = vcmp.lt.s32.totalorder %v660_v61, %v1949_v0  ;;  %vm682_vm7 = vcmp.lt.s32.totalorder %v664_v63, %v1949_v0  ;;  %vm676_vm8 = vcmp.lt.s32.totalorder %v658_v1, %v1949_v0  ;;  %vm680_vm9 = vcmp.lt.s32.totalorder %v662_v3, %v1949_v0 }
 0x163   : > { %1142 = vmatmul.mubr.msk.bf16.vlgmr.msra.gmra.mrb[0].mxu0 %vm427_vm3, %v1327_v21  ;;  %vm679_vm10 = vcmp.lt.s32.totalorder %v661_v4, %v1949_v0  ;;  %vm677_vm11 = vcmp.lt.s32.totalorder %v659_v5, %v1949_v0  ;;  %vm683_vm12 = vcmp.lt.s32.totalorder %v665_v6, %v1949_v0  ;;  %vm681_vm13 = vcmp.lt.s32.totalorder %v663_v7, %v1949_v0 }
 0x164   : > { %1145 = vmatprep.mubr.msk.bf16.mxu0 %vm1579_vm2, %v1578_v17  ;;  %v650_v15 = vadd.s32 72, %v1935_v50  ;;  %v668_v20 = vadd.s32 %v1940_v53, %v651_v8  ;;  %v666_v25 = vadd.s32 %v1940_v53, %v649_v9 }
 0x166   : > { %vm686_vm14 = vcmp.lt.s32.totalorder %v668_v20, %v1949_v0  ;;  %vm684_vm15 = vcmp.lt.s32.totalorder %v666_v25, %v1949_v0 }
 0x16b   : > { %1146 = vmatmul.mubr.msk.bf16.gmra.mrb[4].mxu0 %vm427_vm3, %v1328_v22 }
 0x16c   : > { %1149 = vmatprep.mubr.msk.bf16.mxu0 %vm1579_vm2, %v1578_v17 }
 0x173   : > { %1150 = vmatmul.mubr.msk.bf16.gmra.mrb[8].mxu0 %vm427_vm3, %v1329_v23 }
 0x236   : > { %v471_v26 = vpop.f32.mrb[0].mxu0 }
 0x237   : > { %v1143_v27 = vpop.f32.mrb[1].mxu0 }
 0x238   : > { %v474_v28 = vpop.f32.mrb[2].mxu0 }
 0x239   : > { %v493_v29 = vpack.c.bf16 %v474_v28, %v471_v26  ;;  %v1144_v30 = vpop.f32.mrb[3].mxu0 }
 0x23e   : > { %v1921_v31 = vpop.f32.mrb[4].mxu0 }
 0x23f   : > { %v1147_v32 = vpop.f32.mrb[5].mxu0 }
 0x240   : > { %v1923_v33 = vpop.f32.mrb[6].mxu0  ;;  %v667_v32 = vadd.s32 %v1940_v53, %v650_v15 }
 0x241   : > { %v494_v34 = vpack.c.bf16 %v1923_v33, %v1921_v31  ;;  %v1148_v35 = vpop.f32.mrb[7].mxu0 }
 0x242   : > { %v655_v35 = vadd.s32 112, %v1935_v50  ;;  %vm685_vm1 = vcmp.lt.s32.totalorder %v667_v32, %v1949_v0 }
 0x246   : > { %v487_v36 = vpop.f32.mrb[8].mxu0 }
 0x247   : > { %v1151_v37 = vpop.f32.mrb[9].mxu0  ;;  %v495_v38 = vpack.c.bf16 %v487_v36, %v487_v36  ;;  %v653_v36 = vadd.s32 96, %v1935_v50 }
 0x248   : > { %v490_v39 = vpop.f32.mrb[10].mxu0 }
 0x249   : > { %497 = vxpose.xlu0.c.b16.start.end [1/1] (short) %v495_v38, 128  ;;  %v1152_v40 = vpop.f32.mrb[11].mxu0  ;;  %v656_v38 = vadd.s32 120, %v1935_v50  ;;  %v670_v49 = vadd.s32 %v1940_v53, %v653_v36 }
 0x24b   : > { %v673_v54 = vadd.s32 %v1940_v53, %v656_v38  ;;  %vm688_vm3 = vcmp.lt.s32.totalorder %v670_v49, %v1949_v0 }
 0x24d   : > { %vm691_vm4 = vcmp.lt.s32.totalorder %v673_v54, %v1949_v0 }
 0x2af   : > { %v505_v41 = vpop.trf.xlu0 }
 0x2b0   : > { %1155 = vmatprep.mubr.msk.bf16.mxu1 %vm513_vm5, %v505_v41  ;;  %v654_v41 = vadd.s32 104, %v1935_v50 }
 0x2b2   : > { %v671_v56 = vadd.s32 %v1940_v53, %v654_v41 }
 0x2b3   : > { %v506_v42 = vpop.trf.xlu0 }
 0x2b4   : > { %1156 = vmatmul.mubr.msk.bf16.vlgmr.msra.gmra.mrb[0].mxu1 %vm513_vm5, %v506_v42 }
 0x2b7   : > { %v507_v43 = vpop.trf.xlu0 }
 0x2b8   : > { %1159 = vmatprep.mubr.msk.bf16.mxu1 %vm513_vm5, %v507_v43 }
 0x2bb   : > { %v508_v44 = vpop.trf.xlu0 }
 0x2bc   : > { %1160 = vmatmul.mubr.msk.bf16.gmra.mrb[4].mxu1 %vm513_vm5, %v508_v44 }
 0x2bf   : > { %v509_v45 = vpop.trf.xlu0 }
 0x2c0   : > { %1163 = vmatprep.mubr.msk.bf16.mxu1 %vm513_vm5, %v509_v45  ;;  %v672_v45 = vadd.s32 %v1940_v53, %v655_v35 }
 0x2c2   : > { %vm690_vm2 = vcmp.lt.s32.totalorder %v672_v45, %v1949_v0 }
 0x2c3   : > { %v510_v46 = vpop.trf.xlu0 }
 0x2c4   : > { %1164 = vmatmul.mubr.msk.bf16.gmra.mrb[8].mxu1 %vm513_vm5, %v510_v46 }
 0x2c7   : > { %v511_v47 = vpop.trf.xlu0 }
 0x2c8   : > { %1167 = vmatprep.mubr.msk.bf16.mxu1 %vm513_vm5, %v511_v47 }
 0x2cb   : > { %v512_v48 = vpop.trf.xlu0 }
 0x2cc   : > { %1168 = vmatmul.mubr.msk.bf16.gmra.mrb[12].mxu1 %vm513_vm5, %v512_v48  ;;  %vm689_vm5 = vcmp.lt.s32.totalorder %v671_v56, %v1949_v0 }
 0x2cd   : > { %1187 = vmatprep.mubr.bf16.mxu1 %v493_v29  ;;  %v669_v29 = vadd.s32 %v1940_v53, %v652_v11 }
 0x2cf   : > { %vm687_vm0 = vcmp.lt.s32.totalorder %v669_v29, %v1949_v0 }
 0x387   : > { %v1157_v55 = vpop.f32.mrb[0].mxu1 }
 0x388   : > { %v576_v59 = vpop.f32.mrb[1].mxu1  ;;  %v1968_v12 = vsel %vm678_vm6, %v1157_v55, -1e+30 }
 0x389   : > { %v1158_v62 = vpop.f32.mrb[2].mxu1  ;;  %v1974_v16 = vsel %vm676_vm8, %v576_v59, -1e+30 }
 0x38a   : > { %v579_v2 = vpop.f32.mrb[3].mxu1  ;;  %v1981_v21 = vsel %vm679_vm10, %v1158_v62, -1e+30 }
 0x38b   : > { %v1990_v26 = vsel %vm677_vm11, %v579_v2, -1e+30 }
 0x38f   : > { %v1161_v10 = vpop.f32.mrb[4].mxu1 }
 0x390   : > { %v1970_v13 = vsel %vm682_vm7, %v1161_v10, -1e+30  ;;  %v592_v14 = vpop.f32.mrb[5].mxu1 }
 0x391   : > { %v711_v17 = vmax.f32 %v1968_v12, %v1970_v13  ;;  %v1978_v18 = vsel %vm680_vm9, %v592_v14, -1e+30  ;;  %v1162_v19 = vpop.f32.mrb[6].mxu1  ;;  %v708_v14 = vld [vmem:[#allocation2] sm:$0x1] }
 0x392   : > { %v709_v22 = vmax.f32 %v1974_v16, %v1978_v18  ;;  %v1985_v23 = vsel %vm683_vm12, %v1162_v19, -1e+30  ;;  %v595_v24 = vpop.f32.mrb[7].mxu1 }
 0x393   : > { %v712_v27 = vmax.f32 %v1981_v21, %v1985_v23  ;;  %v1994_v28 = vsel %vm681_vm13, %v595_v24, -1e+30 }
 0x394   : > { %v710_v30 = vmax.f32 %v1990_v26, %v1994_v28 }
 0x397   : > { %v1165_v37 = vpop.f32.mrb[8].mxu1 }
 0x398   : > { %v2006_v39 = vsel %vm686_vm14, %v1165_v37, -1e+30  ;;  %v608_v40 = vpop.f32.mrb[9].mxu1 }
 0x399   : > { %v715_v42 = vmax.f32 %v711_v17, %v2006_v39  ;;  %v2011_v43 = vsel %vm684_vm15, %v608_v40, -1e+30  ;;  %v1166_v44 = vpop.f32.mrb[10].mxu1  ;;  %v2038_v17 = vsub.s32 0, %v1935_v50 }
 0x39a   : > { %v713_v46 = vmax.f32 %v709_v22, %v2011_v43  ;;  %v2015_v47 = vsel %vm687_vm0, %v1166_v44, -1e+30  ;;  %v611_v48 = vpop.f32.mrb[11].mxu1 }
 0x39b   : > { %v716_v51 = vmax.f32 %v712_v27, %v2015_v47  ;;  %v2019_v52 = vsel %vm685_vm1, %v611_v48, -1e+30 }
 0x39c   : > { %v714_v55 = vmax.f32 %v710_v30, %v2019_v52 }
 0x39f   : > { %v1169_v57 = vpop.f32.mrb[12].mxu1 }
 0x3a0   : > { %v2027_v58 = vsel %vm690_vm2, %v1169_v57, -1e+30  ;;  %v624_v59 = vpop.f32.mrb[13].mxu1 }
 0x3a1   : > { %v719_v60 = vmax.f32 %v715_v42, %v2027_v58  ;;  %v2031_v61 = vsel %vm688_vm3, %v624_v59, -1e+30  ;;  %v1170_v62 = vpop.f32.mrb[14].mxu1 }
 0x3a2   : > { %v717_v63 = vmax.f32 %v713_v46, %v2031_v61  ;;  %v2034_v53 = vsel %vm691_vm4, %v1170_v62, -1e+30  ;;  %v627_v1 = vpop.f32.mrb[15].mxu1 }
 0x3a3   : > { %v720_v2 = vmax.f32 %v716_v51, %v2034_v53  ;;  %v705_v3 = vsel %vm689_vm5, %v627_v1, -1e+30 }
 0x3a4   : > { %v718_v4 = vmax.f32 %v714_v55, %v705_v3 }
 0x3a5   : > { %v722_v5 = vmax.f32 %v719_v60, %v720_v2 }
 0x3a6   : > { %v721_v6 = vmax.f32 %v717_v63, %v718_v4 }
 0x3a8   : > { %v723_v7 = vmax.f32 %v721_v6, %v722_v5 }
 0x3aa   : > { %v724_v8 = vrot.slane %v723_v7, 4 }
 0x3ac   : > { %v725_v9 = vmax.f32 %v723_v7, %v724_v8 }
 0x3ae   : > { %v726_v0 = vrot.slane %v725_v9, 2 }
 0x3b0   : > { %v727_v10 = vmax.f32 %v725_v9, %v726_v0 }
 0x3b2   : > { %v728_v11 = vrot.slane %v727_v10, 1 }
 0x3b4   : > { %v729_v15 = vmax.f32 %v727_v10, %v728_v11 }
 0x3b6   : > { %v730_v19 = vmax.f32 %v708_v14, %v729_v15 }
 0x3b8   : > { %v731_v20 = vsub.f32 %v708_v14, %v730_v19  ;;  %v738_v22 = vrot.slane %v730_v19, %v2038_v17  ;;  %892 = vst [vmem:[#allocation2] sm:$0x1] %v730_v19 }
 0x3ba   : > { %v732_v24 = vmul.f32 1.442695, %v731_v20  ;;  %v740_v25 = vsub.f32 %v1974_v16, %v738_v22  ;;  %v741_v27 = vsub.f32 %v1990_v26, %v738_v22  ;;  %v742_v29 = vsub.f32 %v1968_v12, %v738_v22 }
 0x3bb   : > { %v743_v30 = vsub.f32 %v1981_v21, %v738_v22  ;;  %v744_v32 = vsub.f32 %v1978_v18, %v738_v22  ;;  %v745_v35 = vsub.f32 %v1994_v28, %v738_v22  ;;  %v746_v50 = vsub.f32 %v1970_v13, %v738_v22 }
 0x3bc   : > { %1330 = vpow2.f32 %v732_v24  ;;  %v747_v36 = vsub.f32 %v1985_v23, %v738_v22  ;;  %v748_v37 = vsub.f32 %v2011_v43, %v738_v22  ;;  %v749_v38 = vsub.f32 %v2019_v52, %v738_v22 }
 0x3bd   : > { %v750_v16 = vsub.f32 %v2006_v39, %v738_v22  ;;  %v751_v26 = vsub.f32 %v2015_v47, %v738_v22  ;;  %v752_v12 = vsub.f32 %v2031_v61, %v738_v22  ;;  %v753_v21 = vsub.f32 %v705_v3, %v738_v22 }
 0x3be   : > { %v756_v40 = vmul.f32 1.442695, %v740_v25  ;;  %v758_v18 = vmul.f32 1.442695, %v741_v27  ;;  %v760_v41 = vmul.f32 1.442695, %v742_v29  ;;  %v754_v28 = vsub.f32 %v2027_v58, %v738_v22 }
 0x3bf   : > { %v762_v13 = vmul.f32 1.442695, %v743_v30  ;;  %v755_v42 = vsub.f32 %v2034_v53, %v738_v22  ;;  %v764_v23 = vmul.f32 1.442695, %v744_v32  ;;  %v766_v43 = vmul.f32 1.442695, %v745_v35 }
 0x3c0   : > { %1332 = vpow2.f32 %v756_v40  ;;  %v768_v44 = vmul.f32 1.442695, %v746_v50  ;;  %v770_v39 = vmul.f32 1.442695, %v747_v36  ;;  %v772_v45 = vmul.f32 1.442695, %v748_v37 }
 0x3c1   : > { %1334 = vpow2.f32 %v758_v18  ;;  %v774_v46 = vmul.f32 1.442695, %v749_v38  ;;  %v776_v48 = vmul.f32 1.442695, %v750_v16  ;;  %v778_v49 = vmul.f32 1.442695, %v751_v26 }
 0x3c2   : > { %1336 = vpow2.f32 %v760_v41  ;;  %v780_v52 = vmul.f32 1.442695, %v752_v12  ;;  %v782_v54 = vmul.f32 1.442695, %v753_v21  ;;  %v784_v56 = vmul.f32 1.442695, %v754_v28 }
 0x3c3   : > { %1338 = vpow2.f32 %v762_v13  ;;  %v786_v58 = vmul.f32 1.442695, %v755_v42  ;;  %v788_v28 = vld [vmem:[#allocation3] sm:$0x1] }
 0x3c4   : > { %1340 = vpow2.f32 %v764_v23 }
 0x3c5   : > { %1342 = vpow2.f32 %v766_v43 }
 0x3c6   : > { %v2056_v47 = vpop.eup %1330  ;;  %1344 = vpow2.f32 %v768_v44  ;;  %v815_v44 = vld [vmem:[#allocation4 + $0x10] sm:$0xff] }
 0x3c7   : > { %1346 = vpow2.f32 %v770_v39  ;;  %v2060_v51 = vrot.slane %v2056_v47, %v2038_v17  ;;  %v789_v42 = vmul.f32 %v2056_v47, %v788_v28  ;;  %v813_v39 = vld [vmem:[#allocation4] sm:$0xff] }
 0x3c8   : > { %1348 = vpow2.f32 %v772_v45  ;;  %v816_v45 = vld [vmem:[#allocation4 + $0x18] sm:$0xff] }
 0x3c9   : > { %1350 = vpow2.f32 %v774_v46  ;;  %v825_v46 = vmul.f32 %v2060_v51, %v815_v44  ;;  %v826_v33 = vmul.f32 %v2060_v51, %v816_v45 }
 0x3ca   : > { %v1333_v55 = vpop.eup %1332  ;;  %1352 = vpow2.f32 %v776_v48  ;;  %v814_v48 = vld [vmem:[#allocation4 + $0x8] sm:$0xff] }
 0x3cb   : > { %v1335_v57 = vpop.eup %1334  ;;  %1354 = vpow2.f32 %v778_v49  ;;  %v824_v47 = vmul.f32 %v2060_v51, %v814_v48 }
 0x3cc   : > { %v1337_v59 = vpop.eup %1336  ;;  %1356 = vpow2.f32 %v780_v52  ;;  %v790_v60 = vadd.f32 %v1335_v57, %v1333_v55  ;;  %v827_v61 = vpack.c.bf16 %v1335_v57, %v1333_v55  ;;  %v823_v52 = vmul.f32 %v2060_v51, %v813_v39 }
 0x3cd   : > { %v1339_v62 = vpop.eup %1338  ;;  %1358 = vpow2.f32 %v782_v54 }
 0x3ce   : > { %v1341_v63 = vpop.eup %1340  ;;  %v791_v53 = vadd.f32 %v1337_v59, %v790_v60  ;;  %1171 = vmatprep.subr.bf16.mxu1 %v827_v61  ;;  %v828_v1 = vpack.c.bf16 %v1339_v62, %v1337_v59  ;;  %1360 = vpow2.f32 %v784_v56 }
 0x3cf   : > { %v1343_v2 = vpop.eup %1342  ;;  %1172 = vmatpush3.bf16.msra.mxu1 %v827_v61  ;;  %1362 = vpow2.f32 %v786_v58 }
 0x3d0   : > { %v1345_v3 = vpop.eup %1344  ;;  %v792_v4 = vadd.f32 %v1339_v62, %v791_v53  ;;  %1173 = vmatprep.subr.bf16.mxu1 %v828_v1  ;;  %v829_v5 = vpack.c.bf16 %v1343_v2, %v1341_v63 }
 0x3d1   : > { %v1347_v6 = vpop.eup %1346 }
 0x3d2   : > { %v1349_v7 = vpop.eup %1348  ;;  %v793_v8 = vadd.f32 %v1341_v63, %v792_v4  ;;  %v830_v9 = vpack.c.bf16 %v1347_v6, %v1345_v3 }
 0x3d3   : > { %v1351_v0 = vpop.eup %1350  ;;  %1174 = vmatpush3.bf16.msra.mxu1 %v828_v1  ;;  %v914_v1 = vstv (!%p1096_p9), %s899_s9 }
 0x3d4   : > { %v1353_v10 = vpop.eup %1352  ;;  %v794_v11 = vadd.f32 %v1343_v2, %v793_v8  ;;  %1175 = vmatprep.subr.bf16.mxu1 %v829_v5  ;;  %v831_v14 = vpack.c.bf16 %v1351_v0, %v1349_v7  ;;  %v921_v8 = vld [vmem:[%s1885_s21 + $0x10] sm:$0xff] (!%p1096_p9) }
 0x3d5   : > { %v1355_v15 = vpop.eup %1354 }
 0x3d6   : > { %v1357_v19 = vpop.eup %1356  ;;  %v795_v20 = vadd.f32 %v1345_v3, %v794_v11  ;;  %v832_v22 = vpack.c.bf16 %v1355_v15, %v1353_v10  ;;  %v919_v3 = vld [vmem:[%s1885_s21] sm:$0xff] (!%p1096_p9) }
 0x3d7   : > { %v1359_v24 = vpop.eup %1358  ;;  %1176 = vmatpush3.bf16.msra.mxu1 %v829_v5 }
 0x3d8   : > { %v1361_v25 = vpop.eup %1360  ;;  %v796_v27 = vadd.f32 %v1347_v6, %v795_v20  ;;  %1177 = vmatprep.subr.bf16.mxu1 %v830_v9  ;;  %v833_v29 = vpack.c.bf16 %v1359_v24, %v1357_v19 }
 0x3d9   : > { %v1363_v30 = vpop.eup %1362 }
 0x3da   : > { %v797_v32 = vadd.f32 %v1349_v7, %v796_v27  ;;  %v834_v35 = vpack.c.bf16 %v1363_v30, %v1361_v25  ;;  %v920_v7 = vld [vmem:[%s1885_s21 + $0x8] sm:$0xff] (!%p1096_p9) }
 0x3db   : > { %1178 = vmatpush3.bf16.msra.mxu1 %v830_v9  ;;  %v922_v9 = vld [vmem:[%s1885_s21 + $0x18] sm:$0xff] (!%p1096_p9) }
 0x3dc   : > { %v798_v50 = vadd.f32 %v1351_v0, %v797_v32  ;;  %1179 = vmatprep.subr.bf16.mxu1 %v831_v14 }
 0x3de   : > { %v799_v36 = vadd.f32 %v1353_v10, %v798_v50 }
 0x3df   : > { %1180 = vmatpush3.bf16.msra.mxu1 %v831_v14 }
 0x3e0   : > { %v800_v37 = vadd.f32 %v1355_v15, %v799_v36  ;;  %1181 = vmatprep.subr.bf16.mxu1 %v832_v22 }
 0x3e2   : > { %v801_v38 = vadd.f32 %v1357_v19, %v800_v37 }
 0x3e3   : > { %1182 = vmatpush3.bf16.msra.mxu1 %v832_v22 }
 0x3e4   : > { %v802_v16 = vadd.f32 %v1359_v24, %v801_v38  ;;  %1183 = vmatprep.subr.bf16.mxu1 %v833_v29 }
 0x3e6   : > { %v803_v26 = vadd.f32 %v1361_v25, %v802_v16 }
 0x3e7   : > { %1184 = vmatpush3.bf16.msra.mxu1 %v833_v29 }
 0x3e8   : > { %v804_v12 = vadd.f32 %v1363_v30, %v803_v26  ;;  %1185 = vmatprep.subr.bf16.mxu1 %v834_v35 }
 0x3ea   : > { %v805_v21 = vrot.slane %v804_v12, 4 }
 0x3eb   : > { %1186 = vmatpush3.bf16.msra.mxu1 %v834_v35 }
 0x3ec   : > { %v806_v40 = vadd.f32 %v805_v21, %v804_v12 }
 0x3ee   : > { %v807_v18 = vrot.slane %v806_v40, 2  ;;  %1188 = vmatmul.mubr.bf16.vlgmr.msra.gmra.mrb[16].mxu1 %v494_v34 }
 0x3f0   : > { %v808_v41 = vadd.f32 %v807_v18, %v806_v40 }
 0x3f2   : > { %v809_v13 = vrot.slane %v808_v41, 1 }
 0x3f4   : > { %v810_v23 = vadd.f32 %v809_v13, %v808_v41 }
 0x3f6   : > { %v811_v43 = vadd.f32 %v810_v23, %v789_v42 }
 0x3f8   : > { %812 = vst [vmem:[#allocation3] sm:$0x1] %v811_v43 }
 0x3ff   : > { %v897_v59 = vld [vmem:[#allocation3] sm:$0x1] (!%p1096_p9) }
 0x400   : > { %1364 = vrcp.f32 (!%p1096_p9), %v897_v59 }
 0x40a   : > { %v1365_v61 = vpop.eup (!%p1096_p9), %1364 }
 0x40b   : > { %v908_v53 = vrot.slane (!%p1096_p9), %v1365_v61, %v2038_v17 }
 0x4c1   : > { %v1189_v49 = vpop.f32.mrb[16].mxu1  ;;  %896 = sbr.rel (%p1096_p9) target bundleno = 1238 (0x4d6), region = 60 }
 0x4c2   : > { %v886_v54 = vadd.f32 %v1189_v49, %v825_v46  ;;  %v869_v31 = vpop.f32.mrb[17].mxu1 }
 0x4c3   : > { %v884_v34 = vadd.f32 %v869_v31, %v823_v52  ;;  %v1190_v55 = vpop.f32.mrb[18].mxu1 }
 0x4c4   : > { %890 = vst [vmem:[#allocation4 + $0x10] sm:$0xff] %v886_v54  ;;  %v887_v56 = vadd.f32 %v1190_v55, %v826_v33  ;;  %v872_v57 = vpop.f32.mrb[19].mxu1 }
 0x4c5   : > { %888 = vst [vmem:[#allocation4] sm:$0xff] %v884_v34  ;;  %v885_v58 = vadd.f32 %v872_v57, %v824_v47 }
 0x4c6   : > { %891 = vst [vmem:[#allocation4 + $0x18] sm:$0xff] %v887_v56 }
 0x4c7   : > { %889 = vst [vmem:[#allocation4 + $0x8] sm:$0xff] %v885_v58 }
 0x4cb   : > { %v902_v62 = vld [vmem:[#allocation4 + $0x10] sm:$0xff] }
 0x4cc   : > { %v900_v60 = vld [vmem:[#allocation4] sm:$0xff]  ;;  %v912_v5 = vmul.f32 %v908_v53, %v902_v62 }
 0x4cd   : > { %v903_v63 = vld [vmem:[#allocation4 + $0x18] sm:$0xff]  ;;  %v910_v2 = vmul.f32 %v908_v53, %v900_v60 }
 0x4ce   : > { %v901_v51 = vld [vmem:[#allocation4 + $0x8] sm:$0xff]  ;;  %v913_v6 = vmul.f32 %v908_v53, %v903_v63  ;;  %v917_v11 = vmul.f32 %v914_v1, %v912_v5 }
 0x4cf   : > { %v911_v4 = vmul.f32 %v908_v53, %v901_v51  ;;  %v915_v0 = vmul.f32 %v914_v1, %v910_v2 }
 0x4d0   : > { %v918_v14 = vmul.f32 %v914_v1, %v913_v6  ;;  %v925_v17 = vadd.f32 %v921_v8, %v917_v11 }
 0x4d1   : > { %v916_v10 = vmul.f32 %v914_v1, %v911_v4  ;;  %v923_v15 = vadd.f32 %v919_v3, %v915_v0 }
 0x4d2   : > { %v926_v20 = vadd.f32 %v922_v9, %v918_v14  ;;  %929 = vst [vmem:[%s1898_s15 + $0x10] sm:$0xff] %v925_v17 }
 0x4d3   : > { %v924_v19 = vadd.f32 %v920_v7, %v916_v10  ;;  %927 = vst [vmem:[%s1898_s15] sm:$0xff] %v923_v15 }
 0x4d4   : > { %930 = vst [vmem:[%s1898_s15 + $0x18] sm:$0xff] %v926_v20 }
 0x4d5   : > { %928 = vst [vmem:[%s1898_s15 + $0x8] sm:$0xff] %v924_v19 }
 0x4d6 PF: > { %s2218_s30 = sld [smem:[#allocation20_spill]]  ;;  %s1098_s28 = sshll.u32 %s1552_s7, 3 }
 0x4d7   : > { %s943_s21 = sadd.s32 %s1548_s1, %s1098_s28  ;;  %s946_s24 = sshll.u32 %s1898_s15, 4  ;;  %s2083_s24 = int_to_ptr.vmem [resolvable:$true] %s946_s24 }
 0x4d8   : > { %s1099_s18 = sshll.u32 %s943_s21, 7  ;;  %s2219_s19 = sld [smem:[#allocation25_spill]] }
 0x4d9   : > { %s932_s12 = scalar_lea.sflag [#allocation10], %s1881_s13  ;;  %s1426_s6 = scalar_lea.vmem %s2083_s24, 512 }
 0x4da   : > { %p1427_p11 = scmp.ne.s32.totalorder %s2083_s24, %s1426_s6  ;;  %s1580_s7 = smov [#allocation13]  }
 0x4db   : > { %s1430_s1 = sshll.u32 %s1580_s7, 4  ;;  %s1431_s1 = int_to_ptr.vmem [resolvable:$false] %s1430_s1 }
 0x4dc   : > { %p2220_p3 = scmp.ne.s32.totalorder %s2218_s30, 0  ;;  %s1432_s15 = scalar_lea.vmem %s1431_s1, 1024 }
 0x4dd   : > { %p1433_p10 = scmp.lt.s32.totalorder %s2083_s24, %s1431_s1  ;;  %p1434_p7 = scmp.lt.s32.totalorder %s1432_s15, %s1426_s6 }
 0x4de   : > { %s2088_s8 = scalar_lea.hbm %s2219_s19, %s1099_s18  ;;  %p1428_p4 = pnand %p1427_p11, %p2220_p3 }
 0x4df   : > { %p1435_p13 = por %p1434_p7, %p1433_p10 }
 0x4e0   : > { %p1429_p5 = pneg %p1428_p4 }
 0x4e2   : > { %p1436_p2 = pnand %p1435_p13, %p1429_p5 }
 0x4e4   : > { %1439 = shalt.err (!%p1436_p2)
}
 0x4e5   : > { %s1440_s23 = scalar_lea.hbm %s2088_s8, 512  ;;  %s1444_s9 = scalar_lea.hbm %s2219_s19, 2048 }
 0x4e6   : > { %p1441_p12 = scmp.ne.s32.totalorder %s2088_s8, %s1440_s23  ;;  %p1445_p8 = scmp.lt.u32.totalorder %s2088_s8, %s2219_s19 }
 0x4e7   : > { %p1446_p1 = scmp.lt.u32.totalorder %s1444_s9, %s1440_s23  ;;  %p1448_p11 = scmp.lt.u32.totalorder %s1440_s23, %s2088_s8 }
 0x4e8   : > { %p1442_p0 = pnand %p1441_p12, %p2220_p3 }
 0x4e9   : > { %p1447_p9 = por %p1446_p1, %p1445_p8 }
 0x4ea   : > { %p1443_p6 = pneg %p1442_p0 }
 0x4eb   : > { %p1449_p4 = por %p1448_p11, %p1447_p9 }
 0x4ed   : > { %p1450_p5 = pnand %p1449_p4, %p1443_p6 }
 0x4ef   : > { %1453 = shalt.err (!%p1450_p5)
}
 0x4f0   : > { %s1581_s18 = smov 128   ;;  %s1582_s22 = smov 256  }
 0x4f1   : > { %s1583_s14 = smov 8  }
 0x4f2   : > { %1196 = dma.vmem_to_hbm [thread:$0]  (%p2220_p3), %s2083_s24, 512, %s2088_s8, %s932_s12, %s1581_s18, %s1582_s22, %s1583_s14  }
 0x4f3 PF: > { %s2221_s6 = sld [smem:[#allocation17_spill]]  ;;  %s2222_s7 = sld [smem:[#allocation21_spill]] }
 0x4f4   : > { %p1210_p10 = scmp.ge.s32.totalorder %s1568_s11, 2 }
 0x4f9   : > { %s961_s1 = sand.u32 1, %s2221_s6   ;;  %p2223_p7 = scmp.ne.s32.totalorder %s2222_s7, 0 }
 0x4fa   : > { %s962_s15 = scalar_lea.sflag [#allocation10], %s961_s1 }
 0x4fb   : > { %p1206_p13 = pnand %p1210_p10, %p2223_p7 }
 0x4fd   : > { %1515 = dma.done.wait (!%p1206_p13), %s962_s15, 512  }
 0x4fe   : > { %1517 = vsyncadd (!%p1206_p13), %s962_s15, 4294966784  ;;  %s27_s11 = sadd.s32 1, %s1568_s11   ;;  %s2225_s30 = sld [smem:[#allocation18_spill]] }
 0x4ff   : > { %p2119_p2 = scmp.ge.s32.totalorder %s27_s11, 10   ;;  %s2226_s1 = sld [smem:[#allocation19_spill]] }
 0x500   : > { %s2227_s8 = sld [smem:[#allocation22_spill]]  ;;  %s2228_s9 = sld [smem:[#allocation23_spill]] }
 0x501   : > { %s2229_s13 = smov %s2247_s25  ;;  %s2230_s25 = smov %s1524_s26 }
 0x502   : > { %s2231_s26 = smov %s1528_s27  ;;  %s2232_s27 = smov %s1845_s16 }
 0x503   : > { %s2233_s28 = smov %s1536_s29  ;;  %s2234_s29 = smov %s1540_s0 }
 0x504   : > { %s2235_s0 = smov %s1840_s20  ;;  %s2236_s7 = smov %s1564_s10 }
 0x505   : > { %s2237_s10 = smov %s2229_s13  ;;  %26 = sbr.rel (!%p2119_p2) target bundleno = 17 (0x11), region = 110 }
 0x50c   :  { %967 = vsyncpa [#allocation9], 1 }
 0x50d   :  { %969 = vsyncpa [#allocation9 + $0x1], 1 }
 0x50e   :  { %970 = vsyncpa [#allocation12], 1 }
 0x50f   :  { %972 = vsyncpa [#allocation12 + $0x1], 1 }
 0x510   :  { %973 = vsyncpa [#allocation10], 1 }
 0x511   :  { %975 = vsyncpa [#allocation10 + $0x1], 1 }

</bundles_post_ra>
